<compile_context>
chip_gen: v6e
topology: v6e:2x2x1
jax: 0.10.0
libtpu: 0.0.40
codegen_flags: <defaults>
</compile_context>

<pallas_src>
import functools

import jax
import jax.numpy as jnp
from jax import lax
from jax.experimental import pallas as pl
from jax.experimental.pallas import tpu as pltpu


def _self_modeling_loss_kernel(
    targets_ref,     # [tile_b, 1] int32 (VMEM)
    combined_ref,    # [tile_b, C + H] float (VMEM)
    hidden_ref,      # [tile_b, H] float (VMEM)
    ce_out_ref,      # [1, 8, 128] f32 out (resident per-split block)
    mse_out_ref,     # [1, 8, 128] f32 out (resident per-split block)
    ce_acc_ref,      # [1, 1] f32 VMEM scratch (persistent accumulator)
    mse_acc_ref,     # [1, 1] f32 VMEM scratch (persistent accumulator)
    *,
    num_classes: int,
    hidden_dim: int,
    batch_size: int,
    tile_b: int,
):
    s = pl.program_id(0)          # split ("parallel") index
    i = pl.program_id(1)          # batch-tile ("arbitrary") index within the split
    n_steps = pl.num_programs(1)

    # Zero this split's scratch accumulators on its first tile.
    @pl.when(i == 0)
    def _init():
        ce_acc_ref[...] = jnp.zeros_like(ce_acc_ref)
        mse_acc_ref[...] = jnp.zeros_like(mse_acc_ref)

    # Logical (unclamped) block index -> global row offset; used only for masking.
    # (The DMA index_map clamps to the last valid block; rows past B mask to zero.)
    row0 = (s * n_steps + i) * tile_b
    row_ids = row0 + lax.broadcasted_iota(jnp.int32, (tile_b, 1), 0)
    row_mask = row_ids < batch_size                                     # [tile_b, 1]

    # Ref-level column split: views into the loaded VMEM tile, no rotated copy.
    logits = combined_ref[:, :num_classes].astype(jnp.float32)                   # [tile_b, C]
    pred = combined_ref[:, pl.ds(num_classes, hidden_dim)].astype(jnp.float32)   # [tile_b, H]
    hid = hidden_ref[...].astype(jnp.float32)                                    # [tile_b, H]
    tgt = targets_ref[...]                                                       # [tile_b, 1]

    # ---- cross-entropy partial: sum over valid rows of (logsumexp - tgt_logit) ----
    m = jnp.max(logits, axis=-1, keepdims=True)
    lse = jnp.log(jnp.sum(jnp.exp(logits - m), axis=-1, keepdims=True)) + m
    class_ids = lax.broadcasted_iota(jnp.int32, (tile_b, num_classes), 1)
    tgt_logit = jnp.sum(jnp.where(class_ids == tgt, logits, 0.0),
                        axis=-1, keepdims=True)                         # fused select
    # Select (NOT multiply) masking: garbage tail rows may contain Inf/NaN.
    ce_rows = jnp.where(row_mask, lse - tgt_logit, 0.0)                 # [tile_b, 1]
    ce_acc_ref[...] += jnp.sum(ce_rows, axis=0, keepdims=True)          # [1, 1]

    # ---- MSE partial: mask, sublane-reduce first, one lane reduce per step ----
    diff = pred - hid
    sq = jnp.where(row_mask, diff * diff, 0.0)                          # [tile_b, H]
    col_sums = jnp.sum(sq, axis=0, keepdims=True)                       # [1, H]
    mse_acc_ref[...] += jnp.sum(col_sums, axis=-1, keepdims=True)       # [1, 1]

    # Write this split's resident output block exactly once, from scratch.
    @pl.when(i == n_steps - 1)
    def _finalize():
        ce_out_ref[...] = jnp.broadcast_to(
            ce_acc_ref[...].reshape(1, 1, 1), ce_out_ref.shape)
        mse_out_ref[...] = jnp.broadcast_to(
            mse_acc_ref[...].reshape(1, 1, 1), mse_out_ref.shape)


def self_modeling_loss(
    combined_output: jax.Array,      # [B, num_classes + H], f32 or bf16 (unsplit)
    targets: jax.Array,              # [B] int class labels
    hidden_activations: jax.Array,   # [B, H], f32 or bf16
    *,
    num_classes: int,
    classification_weight: float = 1.0,
    aux_task_weight: float = 1.0,
    tile_b: int | None = None,
    num_splits: int = 1,
):
    B, F = combined_output.shape
    H = hidden_activations.shape[-1]
    C = int(num_classes)
    assert F == C + H, (F, C, H)

    targets_2d = targets.astype(jnp.int32).reshape(B, 1)

    cb_item = jnp.dtype(combined_output.dtype).itemsize
    h_item = jnp.dtype(hidden_activations.dtype).itemsize
    # VMEM footprint per row (targets block lane-pads to 128 int32 lanes).
    vmem_bytes_per_row = F * cb_item + H * h_item + 128 * 4
    hbm_bytes_per_row = F * cb_item + H * h_item + 4

    # --- generation-aware VMEM budgets (v5e/v6e: 128 MiB; v7x: 64 MiB per TC) ---
    try:
        vmem_cap = int(pltpu.get_tpu_info().vmem_capacity_bytes)
    except Exception:
        vmem_cap = 64 << 20          # conservative fallback (v7x-sized)
    if vmem_cap >= (96 << 20):
        in_budget, vmem_ceiling = 32 << 20, 80 << 20     # v5e / v6e
    else:
        in_budget, vmem_ceiling = 12 << 20, 48 << 20     # v7x

    # --- batch tile: biggest tile whose double-buffered inputs fit the budget ---
    if tile_b is None:
        tile_b = in_budget // (2 * vmem_bytes_per_row)
    tile_b = int(tile_b)
    if tile_b >= B:
        tile_b = B                                       # single full-extent block
    else:
        tile_b = max(8, min((tile_b // 8) * 8, 4096))
        if tile_b >= B:
            tile_b = B

    total_blocks = -(-B // tile_b)

    # Leading "parallel" axis.  Default 1: v5e/v6e have a single TensorCore and
    # num_splits=1 avoids the clamped overhang step (wasted HBM re-read).
    num_splits = max(1, min(int(num_splits), total_blocks))
    n_steps = -(-total_blocks // num_splits)

    def row_block(s, i):
        # Clamp so an overhang step re-reads the final valid block; its rows are
        # fully masked inside the kernel and contribute zero.
        blk = jnp.minimum(s * n_steps + i, total_blocks - 1)
        return (blk, 0)

    kernel = functools.partial(
        _self_modeling_loss_kernel,
        num_classes=C,
        hidden_dim=H,
        batch_size=B,
        tile_b=tile_b,
    )

    out_shape = (
        jax.ShapeDtypeStruct((num_splits, 8, 128), jnp.float32),  # ce partial sums
        jax.ShapeDtypeStruct((num_splits, 8, 128), jnp.float32),  # mse partial sums
    )

    grid_spec = pltpu.PrefetchScalarGridSpec(
        num_scalar_prefetch=0,
        grid=(num_splits, n_steps),
        in_specs=[
            pl.BlockSpec((tile_b, 1), row_block),    # targets
            pl.BlockSpec((tile_b, F), row_block),    # combined_output (split in-kernel)
            pl.BlockSpec((tile_b, H), row_block),    # hidden activations
        ],
        out_specs=[
            pl.BlockSpec((1, 8, 128), lambda s, i: (s, 0, 0)),
            pl.BlockSpec((1, 8, 128), lambda s, i: (s, 0, 0)),
        ],
        scratch_shapes=[
            pltpu.VMEM((1, 1), jnp.float32),         # ce accumulator
            pltpu.VMEM((1, 1), jnp.float32),         # mse accumulator
        ],
    )

    # Double-buffered inputs + headroom, within the generation ceiling.
    vmem_limit = int(min(max(2 * tile_b * vmem_bytes_per_row + (4 << 20), 32 << 20),
                         vmem_ceiling))
    cost = pl.CostEstimate(
        flops=int(B * (5 * C + 3 * H) + 8 * B),
        transcendentals=int(B * (C + 1)),
        bytes_accessed=int(B * hbm_bytes_per_row + 2 * num_splits * 8 * 128 * 4),
    )

    ce_part, mse_part = pl.pallas_call(
        kernel,
        out_shape=out_shape,
        grid_spec=grid_spec,
        compiler_params=pltpu.CompilerParams(
            dimension_semantics=("parallel", "arbitrary"),
            vmem_limit_bytes=vmem_limit,
        ),
        cost_estimate=cost,
    )(targets_2d, combined_output, hidden_activations)

    # Final combine: a handful of scalar FLOPs in plain JAX.
    ce = jnp.sum(ce_part[:, 0, 0]) / B
    mse = jnp.sum(mse_part[:, 0, 0]) / (B * H)
    total = classification_weight * ce + aux_task_weight * mse
    return ce, mse, total


def _reference(combined_output, targets, hidden_activations, num_classes,
               classification_weight=1.0, aux_task_weight=1.0):
    """Pure-JAX reference mirroring the PyTorch module (sanity check)."""
    combined_output = combined_output.astype(jnp.float32)
    hidden_activations = hidden_activations.astype(jnp.float32)
    logits = combined_output[:, :num_classes]
    pred = combined_output[:, num_classes:]
    lse = jax.nn.logsumexp(logits, axis=-1)
    tgt_logit = jnp.take_along_axis(logits, targets.astype(jnp.int32)[:, None],
                                    axis=-1)[:, 0]
    ce = jnp.mean(lse - tgt_logit)
    mse = jnp.mean((pred - hidden_activations) ** 2)
    return ce, mse, classification_weight * ce + aux_task_weight * mse


if __name__ == "__main__":
    root = jax.random.PRNGKey(0)
    k1, k2, k3, k4, k5, k6, k7, k8, k9 = jax.random.split(root, 9)

    W_CLS, W_AUX = 1.0, 0.5

    # --- Test 1: tiny shapes (single block, single split), f32 -------------------
    B, C, H = 8, 10, 32
    combined = jax.random.normal(k1, (B, C + H), dtype=jnp.float32)
    tgts = jax.random.randint(k2, (B,), 0, C, dtype=jnp.int32)
    hidden = jax.random.normal(k3, (B, H), dtype=jnp.float32)

    ce, mse, total = self_modeling_loss(
        combined, tgts, hidden, num_classes=C,
        classification_weight=W_CLS, aux_task_weight=W_AUX)
    jax.block_until_ready((ce, mse, total))
    ce_r, mse_r, tot_r = _reference(combined, tgts, hidden, C, W_CLS, W_AUX)
    assert jnp.allclose(ce, ce_r, atol=1e-5, rtol=1e-5), (ce, ce_r)
    assert jnp.allclose(mse, mse_r, atol=1e-5, rtol=1e-5), (mse, mse_r)
    assert jnp.allclose(total, tot_r, atol=1e-5, rtol=1e-5), (total, tot_r)

    # --- Test 2: gridded path (masked tail, 2-way split, clamped overhang), f32 --
    B2, C2, H2 = 300, 10, 160
    combined2 = jax.random.normal(k4, (B2, C2 + H2), dtype=jnp.float32)
    tgts2 = jax.random.randint(k5, (B2,), 0, C2, dtype=jnp.int32)
    hidden2 = jax.random.normal(k6, (B2, H2), dtype=jnp.float32)

    ce2, mse2, tot2 = self_modeling_loss(
        combined2, tgts2, hidden2, num_classes=C2,
        classification_weight=W_CLS, aux_task_weight=W_AUX,
        tile_b=64, num_splits=2)
    jax.block_until_ready((ce2, mse2, tot2))
    ce2_r, mse2_r, tot2_r = _reference(combined2, tgts2, hidden2, C2, W_CLS, W_AUX)
    assert jnp.allclose(ce2, ce2_r, atol=1e-4, rtol=1e-4), (ce2, ce2_r)
    assert jnp.allclose(mse2, mse2_r, atol=1e-4, rtol=1e-4), (mse2, mse2_r)
    assert jnp.allclose(tot2, tot2_r, atol=1e-4, rtol=1e-4), (tot2, tot2_r)

    # --- Test 3: bf16 inputs (halved HBM traffic path), gridded, 1 split ---------
    B3, C3, H3 = 96, 10, 64
    combined3 = jax.random.normal(k7, (B3, C3 + H3), dtype=jnp.float32).astype(jnp.bfloat16)
    tgts3 = jax.random.randint(k8, (B3,), 0, C3, dtype=jnp.int32)
    hidden3 = jax.random.normal(k9, (B3, H3), dtype=jnp.float32).astype(jnp.bfloat16)

    ce3, mse3, tot3 = self_modeling_loss(
        combined3, tgts3, hidden3, num_classes=C3,
        classification_weight=W_CLS, aux_task_weight=W_AUX,
        tile_b=32, num_splits=1)
    jax.block_until_ready((ce3, mse3, tot3))
    ce3_r, mse3_r, tot3_r = _reference(combined3, tgts3, hidden3, C3, W_CLS, W_AUX)
    assert jnp.allclose(ce3, ce3_r, atol=2e-4, rtol=2e-4), (ce3, ce3_r)
    assert jnp.allclose(mse3, mse3_r, atol=2e-4, rtol=2e-4), (mse3, mse3_r)
    assert jnp.allclose(tot3, tot3_r, atol=2e-4, rtol=2e-4), (tot3, tot3_r)

    print("KERNEL_OK")
</pallas_src>

<mosaic_0001>
module attributes {stable_mosaic.version = 11 : i64} {
  func.func @_self_modeling_loss_kernel(%arg0: i32, %arg1: i32, %arg2: memref<8x1xi32, #tpu.memory_space<vmem>>, %arg3: memref<8x42xf32, #tpu.memory_space<vmem>>, %arg4: memref<8x32xf32, #tpu.memory_space<vmem>>, %arg5: memref<1x8x128xf32, #tpu.memory_space<vmem>>, %arg6: memref<1x8x128xf32, #tpu.memory_space<vmem>>, %arg7: memref<1x1xf32, #tpu.memory_space<vmem>>, %arg8: memref<1x1xf32, #tpu.memory_space<vmem>>) attributes {dimension_semantics = [#tpu.dimension_semantics<parallel>, #tpu.dimension_semantics<arbitrary>], iteration_bounds = array<i64: 1, 1>, scalar_prefetch = 0 : i64, scratch_operands = 2 : i64, tpu.core_type = #tpu.core_type<tc>, window_params = [{transform_indices = @transform_0, window_bounds = array<i64: 8, 1>}, {transform_indices = @transform_1, window_bounds = array<i64: 8, 42>}, {transform_indices = @transform_2, window_bounds = array<i64: 8, 32>}, {transform_indices = @transform_3, window_bounds = array<i64: 1, 8, 128>}, {transform_indices = @transform_4, window_bounds = array<i64: 1, 8, 128>}]} {
    %c0_i32 = arith.constant 0 : i32
    %0 = arith.cmpi eq, %arg1, %c0_i32 : i32
    %1 = arith.extui %0 : i1 to i32
    %c0_i32_0 = arith.constant 0 : i32
    %2 = arith.cmpi ne, %1, %c0_i32_0 : i32
    scf.if %2 {
      %cst_26 = arith.constant 0.000000e+00 : f32
      %55 = vector.broadcast %cst_26 : f32 to vector<1x1xf32>
      %c0_27 = arith.constant 0 : index
      %c0_28 = arith.constant 0 : index
      %56 = vector.load %arg7[%c0_27, %c0_28] : memref<1x1xf32, #tpu.memory_space<vmem>>, vector<1x1xf32>
      tpu.vector_store %arg7[%c0_27, %c0_28], %55 {strides = array<i32>} : memref<1x1xf32, #tpu.memory_space<vmem>>, vector<1x1xf32>,
      %cst_29 = arith.constant 0.000000e+00 : f32
      %57 = vector.broadcast %cst_29 : f32 to vector<1x1xf32>
      %c0_30 = arith.constant 0 : index
      %c0_31 = arith.constant 0 : index
      %58 = vector.load %arg8[%c0_30, %c0_31] : memref<1x1xf32, #tpu.memory_space<vmem>>, vector<1x1xf32>
      tpu.vector_store %arg8[%c0_30, %c0_31], %57 {strides = array<i32>} : memref<1x1xf32, #tpu.memory_space<vmem>>, vector<1x1xf32>,
    } else {
    }
    %c1_i32 = arith.constant 1 : i32
    %3 = arith.muli %arg0, %c1_i32 : i32
    %4 = arith.addi %3, %arg1 : i32
    %c8_i32 = arith.constant 8 : i32
    %5 = arith.muli %4, %c8_i32 : i32
    %6 = tpu.iota {dimensions = array<i32: 0>} : vector<8x1xi32>
    %7 = vector.broadcast %5 : i32 to vector<8x1xi32>
    %8 = arith.addi %7, %6 : vector<8x1xi32>
    %c8_i32_1 = arith.constant 8 : i32
    %9 = vector.broadcast %c8_i32_1 : i32 to vector<8x1xi32>
    %10 = arith.cmpi slt, %8, %9 : vector<8x1xi32>
    %c0 = arith.constant 0 : index
    %c0_2 = arith.constant 0 : index
    %11 = vector.load %arg3[%c0, %c0_2] : memref<8x42xf32, #tpu.memory_space<vmem>>, vector<8x10xf32>
    %c0_3 = arith.constant 0 : index
    %c10 = arith.constant 10 : index
    %12 = vector.load %arg3[%c0_3, %c10] : memref<8x42xf32, #tpu.memory_space<vmem>>, vector<8x32xf32>
    %c0_4 = arith.constant 0 : index
    %c0_5 = arith.constant 0 : index
    %13 = vector.load %arg4[%c0_4, %c0_5] : memref<8x32xf32, #tpu.memory_space<vmem>>, vector<8x32xf32>
    %c0_6 = arith.constant 0 : index
    %c0_7 = arith.constant 0 : index
    %14 = vector.load %arg2[%c0_6, %c0_7] : memref<8x1xi32, #tpu.memory_space<vmem>>, vector<8x1xi32>
    %cst = arith.constant dense<0xFF800000> : vector<8xf32>
    %15 = vector.multi_reduction <maximumf>, %11, %cst [1] : vector<8x10xf32> to vector<8xf32>
    %16 = vector.shape_cast %15 : vector<8xf32> to vector<8x1xf32>
    %17 = vector.broadcast %16 : vector<8x1xf32> to vector<8x10xf32>
    %18 = arith.subf %11, %17 : vector<8x10xf32>
    %19 = math.exp %18 : vector<8x10xf32>
    %cst_8 = arith.constant dense<0.000000e+00> : vector<8xf32>
    %20 = vector.multi_reduction <add>, %19, %cst_8 [1] : vector<8x10xf32> to vector<8xf32>
    %21 = vector.shape_cast %20 : vector<8xf32> to vector<8x1xf32>
    %22 = math.log %21 : vector<8x1xf32>
    %23 = arith.addf %22, %16 : vector<8x1xf32>
    %24 = tpu.iota {dimensions = array<i32: 1>} : vector<8x10xi32>
    %25 = vector.broadcast %14 : vector<8x1xi32> to vector<8x10xi32>
    %26 = arith.cmpi eq, %24, %25 : vector<8x10xi32>
    %cst_9 = arith.constant 0.000000e+00 : f32
    %27 = vector.broadcast %cst_9 : f32 to vector<8x10xf32>
    %28 = arith.select %26, %11, %27 : vector<8x10xi1>, vector<8x10xf32>
    %cst_10 = arith.constant dense<0.000000e+00> : vector<8xf32>
    %29 = vector.multi_reduction <add>, %28, %cst_10 [1] : vector<8x10xf32> to vector<8xf32>
    %30 = vector.shape_cast %29 : vector<8xf32> to vector<8x1xf32>
    %31 = arith.subf %23, %30 : vector<8x1xf32>
    %cst_11 = arith.constant 0.000000e+00 : f32
    %32 = vector.broadcast %cst_11 : f32 to vector<8x1xf32>
    %33 = arith.select %10, %31, %32 : vector<8x1xi1>, vector<8x1xf32>
    %c0_12 = arith.constant 0 : index
    %c0_13 = arith.constant 0 : index
    %34 = vector.load %arg7[%c0_12, %c0_13] : memref<1x1xf32, #tpu.memory_space<vmem>>, vector<1x1xf32>
    %cst_14 = arith.constant dense<0.000000e+00> : vector<1xf32>
    %35 = vector.multi_reduction <add>, %33, %cst_14 [0] : vector<8x1xf32> to vector<1xf32>
    %36 = vector.shape_cast %35 : vector<1xf32> to vector<1x1xf32>
    %37 = arith.addf %34, %36 : vector<1x1xf32>
    %c0_15 = arith.constant 0 : index
    %c0_16 = arith.constant 0 : index
    %38 = vector.load %arg7[%c0_15, %c0_16] : memref<1x1xf32, #tpu.memory_space<vmem>>, vector<1x1xf32>
    tpu.vector_store %arg7[%c0_15, %c0_16], %37 {strides = array<i32>} : memref<1x1xf32, #tpu.memory_space<vmem>>, vector<1x1xf32>,
    %39 = arith.subf %12, %13 : vector<8x32xf32>
    %40 = arith.mulf %39, %39 : vector<8x32xf32>
    %cst_17 = arith.constant 0.000000e+00 : f32
    %41 = vector.shape_cast %10 : vector<8x1xi1> to vector<8x1xi1>
    %42 = vector.broadcast %41 : vector<8x1xi1> to vector<8x32xi1>
    %43 = vector.broadcast %cst_17 : f32 to vector<8x32xf32>
    %44 = arith.select %42, %40, %43 : vector<8x32xi1>, vector<8x32xf32>
    %cst_18 = arith.constant dense<0.000000e+00> : vector<32xf32>
    %45 = vector.multi_reduction <add>, %44, %cst_18 [0] : vector<8x32xf32> to vector<32xf32>
    %46 = vector.shape_cast %45 : vector<32xf32> to vector<1x32xf32>
    %c0_19 = arith.constant 0 : index
    %c0_20 = arith.constant 0 : index
    %47 = vector.load %arg8[%c0_19, %c0_20] : memref<1x1xf32, #tpu.memory_space<vmem>>, vector<1x1xf32>
    %cst_21 = arith.constant dense<0.000000e+00> : vector<1xf32>
    %48 = vector.multi_reduction <add>, %46, %cst_21 [1] : vector<1x32xf32> to vector<1xf32>
    %49 = vector.shape_cast %48 : vector<1xf32> to vector<1x1xf32>
    %50 = arith.addf %47, %49 : vector<1x1xf32>
    %c0_22 = arith.constant 0 : index
    %c0_23 = arith.constant 0 : index
    %51 = vector.load %arg8[%c0_22, %c0_23] : memref<1x1xf32, #tpu.memory_space<vmem>>, vector<1x1xf32>
    tpu.vector_store %arg8[%c0_22, %c0_23], %50 {strides = array<i32>} : memref<1x1xf32, #tpu.memory_space<vmem>>, vector<1x1xf32>,
    %c0_i32_24 = arith.constant 0 : i32
    %52 = arith.cmpi eq, %arg1, %c0_i32_24 : i32
    %53 = arith.extui %52 : i1 to i32
    %c0_i32_25 = arith.constant 0 : i32
    %54 = arith.cmpi ne, %53, %c0_i32_25 : i32
    scf.if %54 {
      %c0_26 = arith.constant 0 : index
      %c0_27 = arith.constant 0 : index
      %55 = vector.load %arg7[%c0_26, %c0_27] : memref<1x1xf32, #tpu.memory_space<vmem>>, vector<1x1xf32>
      %56 = vector.shape_cast %55 : vector<1x1xf32> to vector<1x1x1xf32>
      %57 = vector.shape_cast %56 : vector<1x1x1xf32> to vector<1x1x1xf32>
      %58 = vector.broadcast %57 : vector<1x1x1xf32> to vector<1x8x128xf32>
      %c0_28 = arith.constant 0 : index
      %c0_29 = arith.constant 0 : index
      %c0_30 = arith.constant 0 : index
      %59 = vector.load %arg5[%c0_28, %c0_29, %c0_30] : memref<1x8x128xf32, #tpu.memory_space<vmem>>, vector<1x8x128xf32>
      tpu.vector_store %arg5[%c0_28, %c0_29, %c0_30], %58 {strides = array<i32>} : memref<1x8x128xf32, #tpu.memory_space<vmem>>, vector<1x8x128xf32>,
      %c0_31 = arith.constant 0 : index
      %c0_32 = arith.constant 0 : index
      %60 = vector.load %arg8[%c0_31, %c0_32] : memref<1x1xf32, #tpu.memory_space<vmem>>, vector<1x1xf32>
      %61 = vector.shape_cast %60 : vector<1x1xf32> to vector<1x1x1xf32>
      %62 = vector.shape_cast %61 : vector<1x1x1xf32> to vector<1x1x1xf32>
      %63 = vector.broadcast %62 : vector<1x1x1xf32> to vector<1x8x128xf32>
      %c0_33 = arith.constant 0 : index
      %c0_34 = arith.constant 0 : index
      %c0_35 = arith.constant 0 : index
      %64 = vector.load %arg6[%c0_33, %c0_34, %c0_35] : memref<1x8x128xf32, #tpu.memory_space<vmem>>, vector<1x8x128xf32>
      tpu.vector_store %arg6[%c0_33, %c0_34, %c0_35], %63 {strides = array<i32>} : memref<1x8x128xf32, #tpu.memory_space<vmem>>, vector<1x8x128xf32>,
    } else {
    }
    return
  }
  func.func @transform_0(%arg0: i32, %arg1: i32) -> (i32, i32) {
    %c1_i32 = arith.constant 1 : i32
    %0 = arith.muli %arg0, %c1_i32 : i32
    %1 = arith.addi %0, %arg1 : i32
    %c0_i32 = arith.constant 0 : i32
    %2 = arith.minsi %1, %c0_i32 : i32
    %c0_i32_0 = arith.constant 0 : i32
    %c0_i32_1 = arith.constant 0 : i32
    return %2, %c0_i32_0 : i32, i32
  }
  func.func @transform_1(%arg0: i32, %arg1: i32) -> (i32, i32) {
    %c1_i32 = arith.constant 1 : i32
    %0 = arith.muli %arg0, %c1_i32 : i32
    %1 = arith.addi %0, %arg1 : i32
    %c0_i32 = arith.constant 0 : i32
    %2 = arith.minsi %1, %c0_i32 : i32
    %c0_i32_0 = arith.constant 0 : i32
    %c0_i32_1 = arith.constant 0 : i32
    return %2, %c0_i32_0 : i32, i32
  }
  func.func @transform_2(%arg0: i32, %arg1: i32) -> (i32, i32) {
    %c1_i32 = arith.constant 1 : i32
    %0 = arith.muli %arg0, %c1_i32 : i32
    %1 = arith.addi %0, %arg1 : i32
    %c0_i32 = arith.constant 0 : i32
    %2 = arith.minsi %1, %c0_i32 : i32
    %c0_i32_0 = arith.constant 0 : i32
    %c0_i32_1 = arith.constant 0 : i32
    return %2, %c0_i32_0 : i32, i32
  }
  func.func @transform_3(%arg0: i32, %arg1: i32) -> (i32, i32, i32) {
    %c0_i32 = arith.constant 0 : i32
    %c0_i32_0 = arith.constant 0 : i32
    %c0_i32_1 = arith.constant 0 : i32
    return %arg0, %c0_i32, %c0_i32_0 : i32, i32, i32
  }
  func.func @transform_4(%arg0: i32, %arg1: i32) -> (i32, i32, i32) {
    %c0_i32 = arith.constant 0 : i32
    %c0_i32_0 = arith.constant 0 : i32
    %c0_i32_1 = arith.constant 0 : i32
    return %arg0, %c0_i32, %c0_i32_0 : i32, i32, i32
  }
}

</mosaic_0001>

<bundles_post_ra>
// kernel: tpu_custom_call.1
= control target key start
LH: loop header
LB: loop body
LE: loop exit
PB: predicated region body
PF: predicated region fallthrough
CT: control target
= control target key end

     0   :  { %10 = vsyncpa [#allocation5], 0  ;;  %s375_s0 = inlined_call_operand.vmem [shape: s32[8,1], index: 0, kind: input, shape index: {}]   ;;  %s376_s1 = inlined_call_operand.vmem [shape: f32[8,42], index: 1, kind: input, shape index: {}]   ;;  %s377_s2 = inlined_call_operand.hbm [shape: f32[8,32], index: 2, kind: input, shape index: {}]   ;;  %s378_s3 = inlined_call_operand.hbm [shape: f32[1,8,128], index: 3, kind: output, shape index: {0}]   ;;  %s379_s4 = inlined_call_operand.hbm [shape: f32[1,8,128], index: 4, kind: output, shape index: {1}]  }
   0x1   :  { %11 = vsyncpa [#allocation6], 0 }
   0x2   :  { %12 = vsyncpa [#allocation9], 0  ;;  %s321_s15 = smov [#allocation4]  }
   0x3   :  { %s48_s16 = sshll.u32 %s321_s15, 4  ;;  %s49_s16 = int_to_ptr.vmem [resolvable:$true] %s48_s16 }
   0x4   :  { %s263_s17 = scalar_lea.vmem %s49_s16, 128  ;;  %p268_p1 = scmp.lt.s32.totalorder %s49_s16, %s49_s16 }
   0x5   :  { %p264_p0 = scmp.ne.s32.totalorder %s49_s16, %s263_s17  ;;  %p269_p2 = scmp.lt.s32.totalorder %s263_s17, %s263_s17 }
   0x7   :  { %p270_p3 = por %p269_p2, %p268_p1 }
   0x9   :  { %p271_p4 = pnand %p270_p3, %p264_p0 }
   0xb   :  { %274 = shalt.err (!%p271_p4)
}
   0xc   :  { %51 = dma.hbm_to_vmem [thread:$0]  %s377_s2, 128, %s49_s16, [#allocation5]  }
   0xd   :  { %315 = dma.done.wait [#allocation5], 128  }
   0xe   :  { %316 = vsyncadd [#allocation5], 4294967168  ;;  %v322_v0 = vmov 0   ;;  %v107_v1 = vld [vmem:[#allocation4] sm:$0xff]  ;;  %s323_s22 = smov 10   ;;  %vm109_vm0 = vcmask 80896   ;;  %v122_v7 = vlaneseq }
   0xf   :  { %249 = vset.pattern.permute.xlu1 %v322_v0  ;;  %250 = vset.pattern.permute.xlu0 %v322_v0  ;;  %v108_v2 = vld [vmem:[%s375_s0] sm:$0xff]  ;;  %vm153_vm1 = vcmask 343120   ;;  %s324_s0 = smov 118   ;;  %vm96_vm3 = vcmask 0   ;;  %v325_v25 = vmov 0.0   ;;  %vm166_vm4 = vcmask 261120  }
  0x10   :  { %145 = vrot.lane.b32.xlu0 %v107_v1, %s323_s22  ;;  %125 = vperm.xlu1 %249, %v108_v2   ;;  %v106_v3 = vld [vmem:[%s376_s1] sm:$0xff]  ;;  %v123_v11 = vand.u32 127, %v122_v7  ;;  %97 = vst.msk [vmem:[#allocation2] sm:$0x1] %vm96_vm3, %v325_v25  ;;  %98 = vst.msk [vmem:[#allocation3] sm:$0x1] %vm96_vm3, %v325_v25 }
  0x11   :  { %v110_v4 = vsel %vm109_vm0, %v106_v3, -inf  ;;  %s326_s1 = smov [#allocation7]  }
  0x12   :  { %s203_s2 = sshll.u32 %s326_s1, 4  ;;  %s204_s2 = int_to_ptr.vmem [resolvable:$true] %s203_s2 }
  0x13   :  { %s275_s25 = scalar_lea.vmem %s204_s2, 128  ;;  %p280_p6 = scmp.lt.s32.totalorder %s204_s2, %s204_s2 }
  0x14   :  { %p276_p5 = scmp.ne.s32.totalorder %s204_s2, %s275_s25  ;;  %p281_p7 = scmp.lt.s32.totalorder %s275_s25, %s275_s25 }
  0x16   :  { %p282_p8 = por %p281_p7, %p280_p6 }
  0x17   :  { %v134_v39 = vld [vmem:[#allocation2] sm:$0x1]  ;;  %v161_v43 = vld [vmem:[#allocation3] sm:$0x1] }
  0x18   :  { %p283_p9 = pnand %p282_p8, %p276_p5 }
  0x2f   :  { %111 = vmax.xlane.f32.xlu0 %v110_v4 }
  0x82   :  { %v146_v5 = vpop.permute.xlu0 %145 }
  0x83   :  { %v148_v6 = vsub.f32 %v106_v3, %v146_v5 }
  0x85   :  { %v149_v8 = vmul.f32 %v148_v6, %v148_v6 }
  0x87   :  { %v154_v9 = vsel %vm153_vm1, %v149_v8, 0.0 }
  0x88   :  { %v155_v10 = vrot.slane %v154_v9, 4 }
  0x8a   :  { %v156_v12 = vadd.f32 %v155_v10, %v154_v9 }
  0x8b   :  { %v126_v13 = vpop.permute.xlu1 %125 }
  0x8c   :  { %v157_v14 = vrot.slane %v156_v12, 2  ;;  %vm127_vm2 = vcmp.eq.s32.totalorder %v123_v11, %v126_v13 }
  0x8d   :  { %v128_v15 = vsel %vm127_vm2, %v106_v3, 0.0 }
  0x8e   :  { %v158_v16 = vadd.f32 %v157_v14, %v156_v12  ;;  %v129_v17 = vsel %vm109_vm0, %v128_v15, 0.0 }
  0x8f   :  { %130 = vadd.xlane.f32.xlu0 %v129_v17 }
  0x90   :  { %v159_v18 = vrot.slane %v158_v16, 1 }
  0x92   :  { %v160_v19 = vadd.f32 %v159_v18, %v158_v16 }
  0x94   :  { %163 = vrot.lane.b32.xlu1 %v160_v19, %s324_s0 }
  0xb8   :  { %v112_v20 = vpop.xlane.xlu0 %111 }
  0xb9   :  { %v113_v21 = vsub.f32 %v106_v3, %v112_v20 }
  0xbb   :  { %v114_v22 = vmul.f32 1.442695, %v113_v21 }
  0xbd   :  { %251 = vpow2.f32 %v114_v22 }
  0xca   :  { %v252_v23 = vpop.eup %251 }
  0xcb   :  { %v116_v24 = vsel %vm109_vm0, %v252_v23, 0.0 }
  0xcc   :  { %117 = vadd.xlane.f32.xlu1 %v116_v24 }
 0x106   :  { %v164_v26 = vpop.permute.xlu1 %163 }
 0x107   :  { %v167_v27 = vsel %vm166_vm4, %v164_v26, 0.0 }
 0x108   :  { %168 = vadd.xlane.f32.xlu0 %v167_v27 }
 0x118   :  { %v131_v31 = vpop.xlane.xlu0 %130 }
 0x155   :  { %v118_v28 = vpop.xlane.xlu1 %117 }
 0x156   :  { %253 = vlog2.f32 %v118_v28 }
 0x163   :  { %v254_v29 = vpop.eup %253 }
 0x164   :  { %v120_v30 = vmul.f32 0.6931472, %v254_v29 }
 0x166   :  { %v121_v32 = vadd.f32 %v120_v30, %v112_v20 }
 0x168   :  { %v132_v33 = vsub.f32 %v121_v32, %v131_v31 }
 0x16a   :  { %v135_v34 = vrot.slane %v132_v33, 4 }
 0x16c   :  { %v136_v35 = vadd.f32 %v135_v34, %v132_v33 }
 0x16e   :  { %v137_v36 = vrot.slane %v136_v35, 2 }
 0x170   :  { %v138_v37 = vadd.f32 %v137_v36, %v136_v35 }
 0x172   :  { %v139_v38 = vrot.slane %v138_v37, 1 }
 0x174   :  { %v140_v40 = vadd.f32 %v139_v38, %v138_v37 }
 0x176   :  { %v141_v41 = vadd.f32 %v140_v40, %v134_v39 }
 0x178   :  { %143 = vst.msk [vmem:[#allocation2] sm:$0x1] %vm96_vm3, %v141_v41 }
 0x17f   :  { %v240_v42 = vld [vmem:[#allocation2] ss:$0 sm:$0xff] }
 0x180   :  { %182 = vperm.xlu0 %250, %v240_v42  }
 0x191   :  { %v169_v44 = vpop.xlane.xlu0 %168 }
 0x192   :  { %v170_v45 = vadd.f32 %v169_v44, %v161_v43 }
 0x194   :  { %171 = vst.msk [vmem:[#allocation3] sm:$0x1] %vm96_vm3, %v170_v45 }
 0x19b   :  { %v241_v46 = vld [vmem:[#allocation3] ss:$0 sm:$0xff] }
 0x19c   :  { %193 = vperm.xlu1 %249, %v241_v46  }
 0x1fb   :  { %v183_v47 = vpop.permute.xlu0 %182 }
 0x1fc   :  { %185 = vst [vmem:[#allocation7] sm:$0xff] %v183_v47 }
 0x1fd   :  { %286 = shalt.err (!%p283_p9)
}
 0x1fe   :  { %206 = dma.vmem_to_hbm [thread:$0]  %s204_s2, 128, %s378_s3, [#allocation6]  }
 0x1ff   :  { %s327_s28 = smov [#allocation8]  }
 0x200   :  { %s213_s29 = sshll.u32 %s327_s28, 4  ;;  %s214_s29 = int_to_ptr.vmem [resolvable:$true] %s213_s29 }
 0x201   :  { %s295_s30 = scalar_lea.vmem %s214_s29, 128  ;;  %p300_p11 = scmp.lt.s32.totalorder %s214_s29, %s214_s29 }
 0x202   :  { %p296_p10 = scmp.ne.s32.totalorder %s214_s29, %s295_s30  ;;  %p301_p12 = scmp.lt.s32.totalorder %s295_s30, %s295_s30 }
 0x204   :  { %p302_p13 = por %p301_p12, %p300_p11 }
 0x206   :  { %p303_p0 = pnand %p302_p13, %p296_p10 }
 0x217   :  { %v194_v48 = vpop.permute.xlu1 %193 }
 0x218   :  { %196 = vst [vmem:[#allocation8] sm:$0xff] %v194_v48 }
 0x219   :  { %306 = shalt.err (!%p303_p0)
}
 0x21a   :  { %216 = dma.vmem_to_hbm [thread:$0]  %s214_s29, 128, %s379_s4, [#allocation9]  }
 0x21b   :  { %317 = dma.done.wait [#allocation6], 128  }
 0x21c   :  { %318 = vsyncadd [#allocation6], 4294967168 }
 0x21d   :  { %319 = dma.done.wait [#allocation9], 128  }
 0x21e   :  { %320 = vsyncadd [#allocation9], 4294967168 }
 0x21f   :  { %223 = vsyncpa [#allocation5], 1 }
 0x220   :  { %224 = vsyncpa [#allocation6], 1 }
 0x221   :  { %225 = vsyncpa [#allocation9], 1 }

</bundles_post_ra>
